<compile_context>
chip_gen: v5e
topology: v5e:2x2
jax: 0.10.0
libtpu: 0.0.40
codegen_flags: <defaults>
</compile_context>

<pallas_src>
import functools

import jax
import jax.numpy as jnp
from jax import lax
from jax.experimental import pallas as pl
from jax.experimental.pallas import tpu as pltpu


def _round_up(x: int, m: int) -> int:
    return ((x + m - 1) // m) * m


def _cdiv(a: int, b: int) -> int:
    return (a + b - 1) // b


def _detect_vmem_capacity_bytes() -> int:
    """Generation-aware VMEM capacity (v5e/v6e: 128 MiB, v7x: 64 MiB)."""
    try:
        cap = getattr(pltpu.get_tpu_info(), "vmem_capacity_bytes", None)
        if cap:
            return int(cap)
    except Exception:
        pass
    return 64 * 1024 * 1024  # conservative (v7x-sized) fallback


_VMEM_CAPACITY = _detect_vmem_capacity_bytes()


# --------------------------------------------------------------------------- #
# Kernels
# --------------------------------------------------------------------------- #
def _grouping_kernel_single(x_ref, g_ref, o_ref):
    """Single K tile:  o = (x @ G)[:, :output_size].  No accumulator, no masks.

    x_ref: (block_m, input_size)   g_ref: (input_size, out_lanes)
    o_ref: (block_m, output_size)  (out_lanes = round_up(output_size, 128);
                                    extra G columns are exactly zero)
    """
    # TODO(synk): when x is f32, a bf16 G operand (lossless 0/1) would halve the
    # MXU passes, but mixed-dtype dot lowering is not guaranteed in Mosaic, so
    # both operands stay in x.dtype for robustness.
    out = jnp.dot(x_ref[...], g_ref[...], preferred_element_type=jnp.float32)
    o_ref[...] = out[:, : o_ref.shape[-1]].astype(o_ref.dtype)


def _grouping_kernel_multi(
    x_ref, g_ref, o_ref, acc_ref, *, input_size, block_k, ragged_k
):
    """Multi K tile: f32 accumulator, ragged-tail mask gated to the last tile.

    x_ref:   (block_m, block_k)       g_ref: (block_k, out_lanes)
    o_ref:   (block_m, output_size)   acc_ref: (block_m, out_lanes) f32 scratch
    """
    k = pl.program_id(1)
    last = pl.num_programs(1) - 1

    @pl.when(k == 0)
    def _init():
        acc_ref[...] = jnp.zeros_like(acc_ref)

    def accum(x):
        acc_ref[...] += jnp.dot(x, g_ref[...], preferred_element_type=jnp.float32)

    if ragged_k:
        # All non-last steps stay pure DMA + MXU (zero VALU mask work); only the
        # last tile (which reads past input_size) masks x.  G rows >= input_size
        # are zero-padded in the wrapper, so the masked x never meets garbage G.
        @pl.when(k < last)
        def _full():
            accum(x_ref[...])

        @pl.when(k == last)
        def _ragged():
            col = k * block_k + lax.broadcasted_iota(jnp.int32, x_ref.shape, 1)
            accum(jnp.where(col < input_size, x_ref[...], 0).astype(x_ref.dtype))
    else:
        accum(x_ref[...])

    @pl.when(k == last)
    def _finalize():
        acc = acc_ref[...]
        o_ref[...] = acc[:, : o_ref.shape[-1]].astype(o_ref.dtype)


# --------------------------------------------------------------------------- #
# Wrapper
# --------------------------------------------------------------------------- #
def _build_grouping_matrix(input_size, output_size, padded_rows, padded_cols, dtype):
    """G[i, j] = 1 iff i < input_size and i % output_size == j (else 0)."""
    rows = jnp.arange(padded_rows, dtype=jnp.int32)[:, None]
    cols = jnp.arange(padded_cols, dtype=jnp.int32)[None, :]
    g = ((rows % output_size) == cols) & (rows < input_size)
    return g.astype(dtype)


@functools.partial(jax.jit, static_argnames=("output_size", "k_cap_override"))
def _mod_grouping_2d(x, output_size, k_cap_override=None):
    """x: (batch, input_size) -> (batch, output_size), output_size <= input_size."""
    batch, input_size = x.shape
    dtype_bytes = x.dtype.itemsize

    vmem_cap = _VMEM_CAPACITY
    vmem_budget = min(int(vmem_cap * 0.55), 72 * 1024 * 1024)
    out_lanes = _round_up(output_size, 128)  # internal (MXU / VMEM) width only

    # ---- K tiling -----------------------------------------------------------
    # (a) single full-width tile, (b) largest 128-multiple divisor of
    # input_size, (c) fixed 128-multiple tiles + last-tile masking.
    k_cap = 8192 if vmem_cap >= 100 * 1024 * 1024 else 4096
    # keep the double-buffered G tile under ~1/3 of the VMEM budget
    g_tile_cap = max(128, (vmem_budget // (6 * out_lanes * dtype_bytes)) // 128 * 128)
    k_cap = min(k_cap, g_tile_cap)
    if k_cap_override is not None:
        k_cap = int(k_cap_override)

    if input_size <= k_cap:
        block_k = input_size
    else:
        block_k = 0
        d = (k_cap // 128) * 128
        while d >= 512:
            if input_size % d == 0:
                block_k = d
                break
            d -= 128
        if block_k == 0:
            block_k = max(128, min(2048, (k_cap // 128) * 128))
    k_tiles = _cdiv(input_size, block_k)
    ragged_k = (k_tiles * block_k) != input_size
    multi_k = k_tiles > 1
    g_rows = k_tiles * block_k

    # ---- M tiling -----------------------------------------------------------
    per_row = 2 * block_k * dtype_bytes + 2 * out_lanes * dtype_bytes
    if multi_k:
        per_row += out_lanes * 4  # f32 accumulator scratch
    fixed = 2 * block_k * out_lanes * dtype_bytes  # (double-buffered) G tile
    avail = max(vmem_budget - fixed, 1 * 1024 * 1024)
    block_m = max(8, min(2048, (avail // per_row) // 8 * 8))
    if batch < 16:
        block_m = batch  # full dim (legal block even if not a multiple of 8)
    else:
        # >= 2 M tiles so both TensorCores of a v7x chip get work.
        block_m = min(block_m, _round_up(_cdiv(batch, 2), 8))
        block_m = min(block_m, _round_up(batch, 8))
    m_tiles = _cdiv(batch, block_m)

    g = _build_grouping_matrix(input_size, output_size, g_rows, out_lanes, x.dtype)

    cost = pl.CostEstimate(
        flops=2 * batch * input_size * output_size,
        transcendentals=0,
        bytes_accessed=(batch * input_size + batch * output_size
                        + g_rows * out_lanes) * dtype_bytes,
    )

    if multi_k:
        kernel = functools.partial(
            _grouping_kernel_multi,
            input_size=input_size, block_k=block_k, ragged_k=ragged_k,
        )
        grid = (m_tiles, k_tiles)
        in_specs = [
            pl.BlockSpec((block_m, block_k), lambda i, k: (i, k)),
            pl.BlockSpec((block_k, out_lanes), lambda i, k: (k, 0)),
        ]
        out_specs = pl.BlockSpec((block_m, output_size), lambda i, k: (i, 0))
        scratch = [pltpu.VMEM((block_m, out_lanes), jnp.float32)]
        dims = ("parallel", "arbitrary")
    else:
        kernel = _grouping_kernel_single
        grid = (m_tiles,)
        in_specs = [
            pl.BlockSpec((block_m, block_k), lambda i: (i, 0)),
            # constant block index -> G is DMA'd to VMEM once, reused every step
            pl.BlockSpec((block_k, out_lanes), lambda i: (0, 0)),
        ]
        out_specs = pl.BlockSpec((block_m, output_size), lambda i: (i, 0))
        scratch = []
        dims = ("parallel",)

    return pl.pallas_call(
        kernel,
        out_shape=jax.ShapeDtypeStruct((batch, output_size), x.dtype),
        grid_spec=pltpu.PrefetchScalarGridSpec(
            num_scalar_prefetch=0,
            grid=grid,
            in_specs=in_specs,
            out_specs=out_specs,
            scratch_shapes=scratch,
        ),
        compiler_params=pltpu.CompilerParams(
            dimension_semantics=dims,
            vmem_limit_bytes=max(
                32 * 1024 * 1024,
                min(vmem_cap - 2 * 1024 * 1024, vmem_budget + 24 * 1024 * 1024),
            ),
        ),
        cost_estimate=cost,
    )(x, g)


class ModGroupingMapper:
    """JAX/Pallas port of the PyTorch ModGroupingMapper (any leading dims)."""

    def __init__(self, input_size: int, output_size: int):
        self.input_size = input_size
        self.output_size = output_size

    def __call__(self, probability_distribution: jnp.ndarray) -> jnp.ndarray:
        x = probability_distribution
        assert x.shape[-1] == self.input_size

        # Pad branch: output_size > input_size -> free zero-pad, no kernel.
        if self.output_size > self.input_size:
            pad = [(0, 0)] * (x.ndim - 1) + [(0, self.output_size - self.input_size)]
            return jnp.pad(x, pad)

        # Identity branch: i % output_size == i for all i.
        if self.output_size == self.input_size:
            return x

        # TODO(synk): integer-dtype inputs would need an exactness guard (the
        # v7x MXU is bf16/fp8 only); the module is defined on probability
        # distributions, so float dtypes are assumed here.
        lead = x.shape[:-1]
        x2 = x.reshape((-1, self.input_size))
        out2 = _mod_grouping_2d(x2, self.output_size)
        return out2.reshape(lead + (self.output_size,))


# --------------------------------------------------------------------------- #
# Reference + tests
# --------------------------------------------------------------------------- #
def _reference(x, input_size, output_size):
    """Plain-JAX reference matching the PyTorch semantics."""
    if output_size > input_size:
        pad = [(0, 0)] * (x.ndim - 1) + [(0, output_size - input_size)]
        return jnp.pad(x, pad)
    idx = jnp.arange(input_size) % output_size
    flat = x.reshape((-1, input_size))
    ref = jax.vmap(
        lambda row: jax.ops.segment_sum(row, idx, num_segments=output_size)
    )(flat)
    return ref.reshape(x.shape[:-1] + (output_size,))


if __name__ == "__main__":
    key = jax.random.PRNGKey(0)
    k1, k2, k3, k4, k5 = jax.random.split(key, 5)

    # Case 1: 2-D input, output_size < input_size (single-K kernel path).
    x1 = jax.nn.softmax(jax.random.normal(k1, (4, 24), jnp.float32), axis=-1)
    o1 = jax.block_until_ready(ModGroupingMapper(24, 8)(x1))
    r1 = _reference(x1, 24, 8)
    assert o1.shape == (4, 8)
    assert jnp.allclose(o1, r1, atol=1e-5, rtol=1e-5)

    # Case 2: 1-D input, output_size > input_size (pure zero-pad branch).
    v2 = jax.nn.softmax(jax.random.normal(k2, (6,), jnp.float32))
    o2 = jax.block_until_ready(ModGroupingMapper(6, 10)(v2))
    assert o2.shape == (10,)
    assert jnp.allclose(o2, _reference(v2, 6, 10), atol=1e-6)

    # Case 3: 3-D input (arbitrary leading dims), kernel path.
    x3 = jax.nn.softmax(jax.random.normal(k3, (2, 3, 24), jnp.float32), axis=-1)
    o3 = jax.block_until_ready(ModGroupingMapper(24, 8)(x3))
    assert o3.shape == (2, 3, 8)
    assert jnp.allclose(o3, _reference(x3, 24, 8), atol=1e-5, rtol=1e-5)

    # Case 4: larger feature dim, non-128 output width (single-K fast path,
    # unpadded masked output store).
    x4 = jax.nn.softmax(jax.random.normal(k4, (8, 2176), jnp.float32), axis=-1)
    o4 = jax.block_until_ready(ModGroupingMapper(2176, 100)(x4))
    r4 = _reference(x4, 2176, 100)
    assert o4.shape == (8, 100)
    assert jnp.allclose(o4, r4, atol=3e-5, rtol=1e-4)

    # Case 5: force the multi-K + ragged-tail + multi-M path via k_cap_override
    # (block_k=128 -> 3 K tiles, last one ragged; batch=40 -> 2 M tiles).
    x5 = jax.nn.softmax(jax.random.normal(k5, (40, 300), jnp.float32), axis=-1)
    o5 = jax.block_until_ready(_mod_grouping_2d(x5, 7, k_cap_override=128))
    r5 = _reference(x5, 300, 7)
    assert o5.shape == (40, 7)
    assert jnp.allclose(o5, r5, atol=3e-5, rtol=1e-4)

    print("KERNEL_OK")
</pallas_src>

<mosaic_0001>
module attributes {stable_mosaic.version = 11 : i64} {
  func.func @_grouping_kernel_single(%arg0: i32, %arg1: memref<4x24xf32, #tpu.memory_space<vmem>>, %arg2: memref<24x128xf32, #tpu.memory_space<vmem>>, %arg3: memref<4x8xf32, #tpu.memory_space<vmem>>) attributes {dimension_semantics = [#tpu.dimension_semantics<parallel>], iteration_bounds = array<i64: 1>, scalar_prefetch = 0 : i64, scratch_operands = 0 : i64, tpu.core_type = #tpu.core_type<tc>, window_params = [{transform_indices = @transform_0, window_bounds = array<i64: 4, 24>}, {pipeline_mode = #tpu.pipeline_mode<synchronous>, transform_indices = @transform_1, window_bounds = array<i64: 24, 128>}, {transform_indices = @transform_2, window_bounds = array<i64: 4, 8>}]} {
    %c0 = arith.constant 0 : index
    %c0_0 = arith.constant 0 : index
    %0 = vector.load %arg1[%c0, %c0_0] : memref<4x24xf32, #tpu.memory_space<vmem>>, vector<4x24xf32>
    %c0_1 = arith.constant 0 : index
    %c0_2 = arith.constant 0 : index
    %1 = vector.load %arg2[%c0_1, %c0_2] : memref<24x128xf32, #tpu.memory_space<vmem>>, vector<24x128xf32>
    %cst = arith.constant dense<0.000000e+00> : vector<4x128xf32>
    %2 = tpu.matmul %0, %1, %cst {dimension_numbers = #tpu.dot_dimension_numbers<[1], [0], [0], [1], [0, 0, 1, 1], [], []>} : vector<4x24xf32>, vector<24x128xf32>, vector<4x128xf32> -> vector<4x128xf32>
    %3 = vector.extract_strided_slice %2 {offsets = [0, 0], sizes = [4, 8], strides = [1, 1]} : vector<4x128xf32> to vector<4x8xf32>
    %c0_3 = arith.constant 0 : index
    %c0_4 = arith.constant 0 : index
    %4 = vector.load %arg3[%c0_3, %c0_4] : memref<4x8xf32, #tpu.memory_space<vmem>>, vector<4x8xf32>
    tpu.vector_store %arg3[%c0_3, %c0_4], %3 {strides = array<i32>} : memref<4x8xf32, #tpu.memory_space<vmem>>, vector<4x8xf32>,
    return
  }
  func.func @transform_0(%arg0: i32) -> (i32, i32) {
    %c0_i32 = arith.constant 0 : i32
    %c0_i32_0 = arith.constant 0 : i32
    return %arg0, %c0_i32 : i32, i32
  }
  func.func @transform_1(%arg0: i32) -> (i32, i32) {
    %c0_i32 = arith.constant 0 : i32
    %c0_i32_0 = arith.constant 0 : i32
    %c0_i32_1 = arith.constant 0 : i32
    return %c0_i32, %c0_i32_0 : i32, i32
  }
  func.func @transform_2(%arg0: i32) -> (i32, i32) {
    %c0_i32 = arith.constant 0 : i32
    %c0_i32_0 = arith.constant 0 : i32
    return %arg0, %c0_i32 : i32, i32
  }
}

</mosaic_0001>

<bundles_post_ra>
// kernel: _mod_grouping_2d.1
= control target key start
LH: loop header
LB: loop body
LE: loop exit
PB: predicated region body
PF: predicated region fallthrough
CT: control target
= control target key end

     0   :  { %s117_s0 = inlined_call_operand.vmem [shape: f32[4,24], index: 0, kind: input, shape index: {}]   ;;  %s118_s1 = inlined_call_operand.vmem [shape: f32[24,128], index: 1, kind: input, shape index: {}]   ;;  %s119_s2 = inlined_call_operand.hbm [shape: f32[4,8], index: 2, kind: output, shape index: {}]  }
   0x1   :  { %v15_v0 = vld [vmem:[%s118_s1 + $0x10] sm:$0xff]  ;;  %v14_v1 = vld [vmem:[%s118_s1 + $0x8] sm:$0xff] }
   0x2   :  { %33 = vmatpush.msra.mxu0 %v15_v0 }
   0x3   :  { %7 = vsyncpa [#allocation3], 0  ;;  %v13_v2 = vld [vmem:[%s118_s1] sm:$0xff]  ;;  %vm16_vm0 = vcmask 195584   ;;  %s86_s17 = smov [#allocation2]   ;;  %s49_s21 = sshll.u32 %s119_s2, 4  ;;  %s50_s21 = int_to_ptr.hbm [resolvable:$true] %s49_s21 }
   0x4   :  { %34 = vmatpush.msra.mxu0 %v14_v1  ;;  %v12_v3 = vld [vmem:[%s117_s0] sm:$0xf]  ;;  %s47_s18 = sshll.u32 %s86_s17, 4  ;;  %vm40_vm1 = vcmask 60416   ;;  %s48_s18 = int_to_ptr.vmem [resolvable:$true] %s47_s18 }
   0x6   :  { %35 = vmatpush.msra.mxu0 %v13_v2 }
   0x7   :  { %58 = vmatmul.msk.f32.vlgmr.msra.gmra.mxu0 %vm16_vm0, %v12_v3 }
  0x84   :  { %v37_v4 = vpop.f32.mrf.mxu0 }
  0x85   :  { %41 = vst.msk [vmem:[#allocation2] sm:$0xf] %vm40_vm1, %v37_v4 }
  0x86   :  { %52 = dma.vmem_to_hbm [thread:$0]  %s48_s18, 64, %s50_s21, [#allocation3]  }
  0x87   :  { %84 = dma.done.wait [#allocation3], 64  }
  0x88   :  { %85 = vsyncadd [#allocation3], 4294967232 }
  0x89   :  { %57 = vsyncpa [#allocation3], 1 }

</bundles_post_ra>
